<compile_context>
chip_gen: v6e
topology: v6e:2x2x1
jax: 0.10.0
libtpu: 0.0.40
codegen_flags: <defaults>
</compile_context>

<pallas_src>
import jax
import jax.numpy as jnp
from jax.experimental import pallas as pl
from jax.experimental.pallas import tpu as pltpu


def _identity_kernel(x_ref, o_ref):
    # The reference forward performs no computation; pure VMEM passthrough.
    o_ref[...] = x_ref[...]


def _sublane_multiple(dtype) -> int:
    """Row-tile granularity: 8 for 4-byte, 16 for 2-byte, 32 for 1-byte dtypes
    (sub-32-bit dtypes pack along sublanes)."""
    itemsize = jnp.dtype(dtype).itemsize
    return max(8, 32 // max(1, itemsize))


def _choose_row_tile(rows: int, cols: int, itemsize: int, mult: int,
                     max_tile_bytes: int = 2 * 1024 * 1024) -> int:
    """Largest multiple-of-`mult` row count whose (tile_rows x cols) tile stays
    under ~2 MiB (so 2 input + 2 output double buffers fit v5e's 16 MiB scoped
    VMEM default), preferring >=2 grid steps so v7x megacore can shard the
    'parallel' axis across both TensorCores.  Ragged last block handled by
    the cdiv grid, so `rows` need not divide evenly."""
    if rows <= mult:
        # Block row dim == full array dim -> always a legal block shape.
        return rows

    bytes_per_row = max(1, cols * itemsize)
    budget_rows = max(mult, (max_tile_bytes // bytes_per_row) // mult * mult)
    tile = min(budget_rows, (rows // mult) * mult)
    tile = max(mult, tile)

    # v7x has 2 TCs per chip: make sure the grid has at least 2 steps when the
    # row count allows it, so the copy drives HBM from both cores.
    if tile >= rows and rows >= 2 * mult:
        half = (rows + 1) // 2
        tile = max(mult, ((half + mult - 1) // mult) * mult)
        if tile >= rows:
            tile = max(mult, tile - mult)
    return tile


def _pallas_identity_copy(x2d: jax.Array) -> jax.Array:
    rows, cols = x2d.shape
    mult = _sublane_multiple(x2d.dtype)
    tile_rows = _choose_row_tile(rows, cols, x2d.dtype.itemsize, mult)
    grid = (pl.cdiv(rows, tile_rows),)
    block = (tile_rows, cols)  # last dim = full cols -> always legal

    return pl.pallas_call(
        _identity_kernel,
        out_shape=jax.ShapeDtypeStruct(x2d.shape, x2d.dtype),
        grid_spec=pltpu.PrefetchScalarGridSpec(
            num_scalar_prefetch=0,
            grid=grid,
            in_specs=[pl.BlockSpec(block, lambda i: (i, 0))],
            out_specs=pl.BlockSpec(block, lambda i: (i, 0)),
        ),
        compiler_params=pltpu.CompilerParams(
            # Row tiles are independent -> shard across TCs on v7x megacore.
            dimension_semantics=("parallel",),
            # 2 MiB tiles x 4 buffers = 8 MiB; 32 MiB gives ample headroom on
            # every generation (v5e/v6e: 128 MiB physical, v7x: 64 MiB).
            vmem_limit_bytes=32 * 1024 * 1024,
        ),
    )(x2d)


def spdnorm_resnet_block_forward(x: jax.Array,
                                 use_pallas_copy: bool = False) -> jax.Array:
    """Forward for the (empty) SPDNormResnetBlock: exact identity.

    Default (fastest, fully faithful): return `x` unchanged — no kernel launch,
    no HBM traffic.  Set `use_pallas_copy=True` to route through the Pallas
    identity-copy kernel (plumbing for when real compute gets fused in).
    """
    if not use_pallas_copy:
        return x

    n, c, h, w = x.shape
    rows, cols = n * c, h * w
    x2d = x.reshape(rows, cols)  # lane-dense slab: last dim = H*W
    out2d = _pallas_identity_copy(x2d)
    return out2d.reshape(n, c, h, w)


if __name__ == "__main__":
    key = jax.random.PRNGKey(0)
    # Small, module-consistent activation shape (NCHW).
    x = jax.random.normal(key, (2, 4, 16, 16), dtype=jnp.float32)

    # Default (recommended) path: pure no-op, no kernel launch.
    out_fast = jax.block_until_ready(spdnorm_resnet_block_forward(x))

    # Pallas plumbing path: run the kernel once and block on it.
    out_kernel = jax.block_until_ready(
        spdnorm_resnet_block_forward(x, use_pallas_copy=True))

    # The reference forward is a no-op, so both paths must be exact
    # passthroughs of the input.
    assert out_fast.shape == x.shape
    assert out_kernel.shape == x.shape
    assert bool(jnp.array_equal(out_fast, x))
    assert bool(jnp.array_equal(out_kernel, x))

    print("KERNEL_OK")
</pallas_src>

<mosaic_0001>
module attributes {stable_mosaic.version = 11 : i64} {
  func.func @_identity_kernel(%arg0: i32, %arg1: memref<8x256xf32, #tpu.memory_space<vmem>>, %arg2: memref<8x256xf32, #tpu.memory_space<vmem>>) attributes {dimension_semantics = [#tpu.dimension_semantics<parallel>], iteration_bounds = array<i64: 1>, scalar_prefetch = 0 : i64, scratch_operands = 0 : i64, tpu.core_type = #tpu.core_type<tc>, window_params = [{transform_indices = @transform_0, window_bounds = array<i64: 8, 256>}, {transform_indices = @transform_1, window_bounds = array<i64: 8, 256>}]} {
    %c0 = arith.constant 0 : index
    %c0_0 = arith.constant 0 : index
    %0 = vector.load %arg1[%c0, %c0_0] : memref<8x256xf32, #tpu.memory_space<vmem>>, vector<8x256xf32>
    %c0_1 = arith.constant 0 : index
    %c0_2 = arith.constant 0 : index
    %1 = vector.load %arg2[%c0_1, %c0_2] : memref<8x256xf32, #tpu.memory_space<vmem>>, vector<8x256xf32>
    tpu.vector_store %arg2[%c0_1, %c0_2], %0 {strides = array<i32>} : memref<8x256xf32, #tpu.memory_space<vmem>>, vector<8x256xf32>,
    return
  }
  func.func @transform_0(%arg0: i32) -> (i32, i32) {
    %c0_i32 = arith.constant 0 : i32
    %c0_i32_0 = arith.constant 0 : i32
    return %arg0, %c0_i32 : i32, i32
  }
  func.func @transform_1(%arg0: i32) -> (i32, i32) {
    %c0_i32 = arith.constant 0 : i32
    %c0_i32_0 = arith.constant 0 : i32
    return %arg0, %c0_i32 : i32, i32
  }
}

</mosaic_0001>

<bundles_post_ra>
// kernel: tpu_custom_call.1
= control target key start
LH: loop header
LB: loop body
LE: loop exit
PB: predicated region body
PF: predicated region fallthrough
CT: control target
= control target key end

     0   :  { %6 = vsyncpa [#allocation3], 0  ;;  %s104_s0 = inlined_call_operand.hbm [shape: f32[8,256], index: 0, kind: input, shape index: {}]   ;;  %s105_s1 = inlined_call_operand.hbm [shape: f32[8,256], index: 1, kind: output, shape index: {}]  }
   0x1   :  { %7 = vsyncpa [#allocation4], 0  ;;  %s86_s6 = smov [#allocation2]  }
   0x2   :  { %s14_s7 = sshll.u32 %s86_s6, 4  ;;  %s15_s7 = int_to_ptr.vmem [resolvable:$true] %s14_s7 }
   0x3   :  { %s50_s8 = scalar_lea.vmem %s15_s7, 256  ;;  %p55_p1 = scmp.lt.s32.totalorder %s15_s7, %s15_s7 }
   0x4   :  { %p51_p0 = scmp.ne.s32.totalorder %s15_s7, %s50_s8  ;;  %p56_p2 = scmp.lt.s32.totalorder %s50_s8, %s50_s8 }
   0x6   :  { %p57_p3 = por %p56_p2, %p55_p1 }
   0x8   :  { %p58_p4 = pnand %p57_p3, %p51_p0 }
   0xa   :  { %61 = shalt.err (!%p58_p4)
}
   0xb   :  { %17 = dma.hbm_to_vmem [thread:$0]  %s104_s0, 256, %s15_s7, [#allocation3]  }
   0xc   :  { %82 = dma.done.wait [#allocation3], 256  }
   0xd   :  { %83 = vsyncadd [#allocation3], 4294967040  ;;  %s87_s11 = smov [#allocation5]   ;;  %v21_v0 = vld [vmem:[#allocation2] sm:$0xff]  ;;  %v22_v1 = vld [vmem:[#allocation2 + $0x8] sm:$0xff] }
   0xe   :  { %s31_s12 = sshll.u32 %s87_s11, 4  ;;  %23 = vst [vmem:[#allocation5] sm:$0xff] %v21_v0  ;;  %24 = vst [vmem:[#allocation5 + $0x8] sm:$0xff] %v22_v1  ;;  %s32_s12 = int_to_ptr.vmem [resolvable:$true] %s31_s12 }
   0xf   :  { %s62_s13 = scalar_lea.vmem %s32_s12, 256  ;;  %p67_p6 = scmp.lt.s32.totalorder %s32_s12, %s32_s12 }
  0x10   :  { %p63_p5 = scmp.ne.s32.totalorder %s32_s12, %s62_s13  ;;  %p68_p7 = scmp.lt.s32.totalorder %s62_s13, %s62_s13 }
  0x12   :  { %p69_p8 = por %p68_p7, %p67_p6 }
  0x14   :  { %p70_p9 = pnand %p69_p8, %p63_p5 }
  0x16   :  { %73 = shalt.err (!%p70_p9)
}
  0x17   :  { %34 = dma.vmem_to_hbm [thread:$0]  %s32_s12, 256, %s105_s1, [#allocation4]  }
  0x18   :  { %84 = dma.done.wait [#allocation4], 256  }
  0x19   :  { %85 = vsyncadd [#allocation4], 4294967040 }
  0x1a   :  { %38 = vsyncpa [#allocation3], 1 }
  0x1b   :  { %39 = vsyncpa [#allocation4], 1 }

</bundles_post_ra>
